<compile_context>
chip_gen: v5e
topology: v5e:2x2
jax: 0.10.0
libtpu: 0.0.40
codegen_flags: <defaults>
</compile_context>

<pallas_src>
import jax
import jax.numpy as jnp
from jax.experimental import pallas as pl
from jax.experimental.pallas import tpu as pltpu


# ------------------------------ kernels ------------------------------------


def _hidden_kernel(z_ref, w1_ref, b1_ref, w2_ref, b2_ref, h_ref):
    """Shared hidden representation h2 (f32 compute, bf16 output)."""
    h1 = jnp.dot(z_ref[...], w1_ref[...],
                 preferred_element_type=jnp.float32) + b1_ref[...]
    h1 = jnp.maximum(h1, 0.0)
    h2 = jnp.dot(h1, w2_ref[...],
                 preferred_element_type=jnp.float32) + b2_ref[...]
    h2 = jnp.maximum(h2, 0.0)
    h_ref[...] = h2.astype(h_ref.dtype)


def _logits_kernel(h_ref, w3_ref, b3_ref, out_ref):
    """One lane tile of the final projection: bf16 x bf16 -> f32 accumulate."""
    out_ref[...] = (
        jnp.dot(h_ref[...], w3_ref[...], preferred_element_type=jnp.float32)
        + b3_ref[...]
    ).astype(out_ref.dtype)


# ------------------------------ wrapper -------------------------------------


def _round_up(x, m):
    return ((x + m - 1) // m) * m


def _choose_out_tile(P, H, B, *, budget_bytes=12 * 1024 * 1024, tn_max=2048):
    """Largest lane tile (multiple of 128) whose double-buffered working set
    fits under the smallest default scoped-VMEM budget (v5e: 16 MiB).  Keeps
    the tile big enough to sit near the measured HBM-roofline knee (>=512
    lanes whenever possible)."""
    tn = min(tn_max, _round_up(P, 128))
    while tn > 128:
        need = (2 * (H * tn * 2        # w3 tile (bf16), double-buffered
                     + tn * 4          # b3 tile (f32), double-buffered
                     + B * tn * 4)     # output tile (f32), double-buffered
                + 2 * B * H * 2)       # resident h2 (bf16), double-buffered
        if need <= budget_bytes:
            break
        tn //= 2
    return max(tn, 128)


def binary_preference_gflownet_forward(z, params, *, tn=None):
    """z: (B, latent_dim) f32.  params: w1,b1,w2,b2 (f32), w3 (bf16), b3 (f32)."""
    w1, b1 = params["w1"], params["b1"]      # (D, H), (1, H)   f32
    w2, b2 = params["w2"], params["b2"]      # (H, H), (1, H)   f32
    w3, b3 = params["w3"], params["b3"]      # (H, P) bf16, (1, P) f32
    B, D = z.shape
    H = w1.shape[1]
    P = w3.shape[1]

    # ---- Stage 1: shared hidden h2 (tiny, one grid step) ----
    h2 = pl.pallas_call(
        _hidden_kernel,
        out_shape=jax.ShapeDtypeStruct((B, H), jnp.bfloat16),
        grid_spec=pltpu.PrefetchScalarGridSpec(
            num_scalar_prefetch=0,
            grid=(1,),
            in_specs=[
                pl.BlockSpec((B, D), lambda i: (0, 0)),   # z
                pl.BlockSpec((D, H), lambda i: (0, 0)),   # w1
                pl.BlockSpec((1, H), lambda i: (0, 0)),   # b1
                pl.BlockSpec((H, H), lambda i: (0, 0)),   # w2
                pl.BlockSpec((1, H), lambda i: (0, 0)),   # b2
            ],
            out_specs=pl.BlockSpec((B, H), lambda i: (0, 0)),
        ),
        cost_estimate=pl.CostEstimate(
            flops=2 * B * (D * H + H * H),
            transcendentals=0,
            bytes_accessed=4 * (B * D + D * H + H * H + 2 * H) + 2 * B * H,
        ),
    )(z, w1, b1, w2, b2)

    # ---- Stage 2: stream the (H, P) projection in large lane tiles ----
    if tn is None:
        tn = _choose_out_tile(P, H, B)
    assert tn % 128 == 0
    P_pad = _round_up(P, tn)
    if P_pad != P:
        w3 = jnp.pad(w3, ((0, 0), (0, P_pad - P)))
        b3 = jnp.pad(b3, ((0, 0), (0, P_pad - P)))

    logits = pl.pallas_call(
        _logits_kernel,
        out_shape=jax.ShapeDtypeStruct((B, P_pad), jnp.float32),
        grid_spec=pltpu.PrefetchScalarGridSpec(
            num_scalar_prefetch=0,
            grid=(P_pad // tn,),
            in_specs=[
                pl.BlockSpec((B, H), lambda j: (0, 0)),    # h2 (grid-invariant)
                pl.BlockSpec((H, tn), lambda j: (0, j)),   # w3 lane tile (bf16)
                pl.BlockSpec((1, tn), lambda j: (0, j)),   # b3 lane tile
            ],
            out_specs=pl.BlockSpec((B, tn), lambda j: (0, j)),
        ),
        compiler_params=pltpu.CompilerParams(
            # Tiles are independent -> megacore split of the P axis on v7x.
            dimension_semantics=("parallel",),
        ),
        cost_estimate=pl.CostEstimate(
            flops=2 * B * H * P_pad,
            transcendentals=0,
            bytes_accessed=H * P_pad * 2 + P_pad * 4 + B * H * 2 + B * P_pad * 4,
        ),
    )(h2, w3, b3)

    if P_pad != P:
        logits = logits[:, :P]
    return logits


# ------------------------------ test harness --------------------------------


def init_params(key, latent_dim, hidden_dim, pool_size):
    """Deterministic synthetic weights, pre-transposed to (in, out).
    w3 is stored in bf16 (bandwidth optimization); everything else f32."""
    ks = jax.random.split(key, 6)
    scale1 = 1.0 / jnp.sqrt(latent_dim)
    scale2 = 1.0 / jnp.sqrt(hidden_dim)
    return {
        "w1": jax.random.uniform(ks[0], (latent_dim, hidden_dim), jnp.float32,
                                 -scale1, scale1),
        "b1": jax.random.uniform(ks[1], (1, hidden_dim), jnp.float32,
                                 -scale1, scale1),
        "w2": jax.random.uniform(ks[2], (hidden_dim, hidden_dim), jnp.float32,
                                 -scale2, scale2),
        "b2": jax.random.uniform(ks[3], (1, hidden_dim), jnp.float32,
                                 -scale2, scale2),
        "w3": jax.random.uniform(ks[4], (hidden_dim, pool_size), jnp.float32,
                                 -scale2, scale2).astype(jnp.bfloat16),
        "b3": jax.random.uniform(ks[5], (1, pool_size), jnp.float32,
                                 -scale2, scale2),
    }


def reference_forward(z, params):
    h1 = jnp.maximum(z @ params["w1"] + params["b1"], 0.0)
    h2 = jnp.maximum(h1 @ params["w2"] + params["b2"], 0.0)
    h2 = h2.astype(jnp.bfloat16)
    logits = jnp.dot(h2, params["w3"], preferred_element_type=jnp.float32)
    return logits + params["b3"]


if __name__ == "__main__":
    # Small shapes consistent with the module (pool_size scaled down from
    # 40000; not a multiple of the lane tile so the padding path is exercised).
    batch, latent_dim, hidden_dim, pool_size = 8, 128, 256, 4000

    key = jax.random.PRNGKey(0)
    k_z, k_p = jax.random.split(key)
    z = jax.random.normal(k_z, (batch, latent_dim), jnp.float32)
    params = init_params(k_p, latent_dim, hidden_dim, pool_size)

    logits = binary_preference_gflownet_forward(z, params)
    logits = jax.block_until_ready(logits)

    ref = reference_forward(z, params)
    assert logits.shape == (batch, pool_size)
    assert jnp.allclose(logits, ref, atol=3e-2, rtol=3e-2), (
        float(jnp.max(jnp.abs(logits - ref))))

    print("KERNEL_OK")
</pallas_src>

<mosaic_0001>
module attributes {stable_mosaic.version = 11 : i64} {
  func.func @_hidden_kernel(%arg0: i32, %arg1: memref<8x128xf32, #tpu.memory_space<vmem>>, %arg2: memref<128x256xf32, #tpu.memory_space<vmem>>, %arg3: memref<1x256xf32, #tpu.memory_space<vmem>>, %arg4: memref<256x256xf32, #tpu.memory_space<vmem>>, %arg5: memref<1x256xf32, #tpu.memory_space<vmem>>, %arg6: memref<8x256xbf16, #tpu.memory_space<vmem>>) attributes {dimension_semantics = [#tpu.dimension_semantics<arbitrary>], iteration_bounds = array<i64: 1>, scalar_prefetch = 0 : i64, scratch_operands = 0 : i64, tpu.core_type = #tpu.core_type<tc>, window_params = [{pipeline_mode = #tpu.pipeline_mode<synchronous>, transform_indices = @transform_0, window_bounds = array<i64: 8, 128>}, {pipeline_mode = #tpu.pipeline_mode<synchronous>, transform_indices = @transform_1, window_bounds = array<i64: 128, 256>}, {pipeline_mode = #tpu.pipeline_mode<synchronous>, transform_indices = @transform_2, window_bounds = array<i64: 1, 256>}, {pipeline_mode = #tpu.pipeline_mode<synchronous>, transform_indices = @transform_3, window_bounds = array<i64: 256, 256>}, {pipeline_mode = #tpu.pipeline_mode<synchronous>, transform_indices = @transform_4, window_bounds = array<i64: 1, 256>}, {pipeline_mode = #tpu.pipeline_mode<synchronous>, transform_indices = @transform_5, window_bounds = array<i64: 8, 256>}]} {
    %c0 = arith.constant 0 : index
    %c0_0 = arith.constant 0 : index
    %0 = vector.load %arg1[%c0, %c0_0] : memref<8x128xf32, #tpu.memory_space<vmem>>, vector<8x128xf32>
    %c0_1 = arith.constant 0 : index
    %c0_2 = arith.constant 0 : index
    %1 = vector.load %arg2[%c0_1, %c0_2] : memref<128x256xf32, #tpu.memory_space<vmem>>, vector<128x256xf32>
    %cst = arith.constant dense<0.000000e+00> : vector<8x256xf32>
    %2 = tpu.matmul %0, %1, %cst {dimension_numbers = #tpu.dot_dimension_numbers<[1], [0], [0], [1], [0, 0, 1, 1], [], []>} : vector<8x128xf32>, vector<128x256xf32>, vector<8x256xf32> -> vector<8x256xf32>
    %c0_3 = arith.constant 0 : index
    %c0_4 = arith.constant 0 : index
    %3 = vector.load %arg3[%c0_3, %c0_4] : memref<1x256xf32, #tpu.memory_space<vmem>>, vector<1x256xf32>
    %4 = vector.broadcast %3 : vector<1x256xf32> to vector<8x256xf32>
    %5 = arith.addf %2, %4 : vector<8x256xf32>
    %cst_5 = arith.constant 0.000000e+00 : f32
    %6 = vector.broadcast %cst_5 : f32 to vector<8x256xf32>
    %7 = arith.maximumf %5, %6 : vector<8x256xf32>
    %c0_6 = arith.constant 0 : index
    %c0_7 = arith.constant 0 : index
    %8 = vector.load %arg4[%c0_6, %c0_7] : memref<256x256xf32, #tpu.memory_space<vmem>>, vector<256x256xf32>
    %cst_8 = arith.constant dense<0.000000e+00> : vector<8x256xf32>
    %9 = tpu.matmul %7, %8, %cst_8 {dimension_numbers = #tpu.dot_dimension_numbers<[1], [0], [0], [1], [0, 0, 1, 1], [], []>} : vector<8x256xf32>, vector<256x256xf32>, vector<8x256xf32> -> vector<8x256xf32>
    %c0_9 = arith.constant 0 : index
    %c0_10 = arith.constant 0 : index
    %10 = vector.load %arg5[%c0_9, %c0_10] : memref<1x256xf32, #tpu.memory_space<vmem>>, vector<1x256xf32>
    %11 = vector.broadcast %10 : vector<1x256xf32> to vector<8x256xf32>
    %12 = arith.addf %9, %11 : vector<8x256xf32>
    %cst_11 = arith.constant 0.000000e+00 : f32
    %13 = vector.broadcast %cst_11 : f32 to vector<8x256xf32>
    %14 = arith.maximumf %12, %13 : vector<8x256xf32>
    %15 = arith.truncf %14 : vector<8x256xf32> to vector<8x256xbf16>
    %c0_12 = arith.constant 0 : index
    %c0_13 = arith.constant 0 : index
    %16 = vector.load %arg6[%c0_12, %c0_13] : memref<8x256xbf16, #tpu.memory_space<vmem>>, vector<8x256xbf16>
    tpu.vector_store %arg6[%c0_12, %c0_13], %15 {strides = array<i32>} : memref<8x256xbf16, #tpu.memory_space<vmem>>, vector<8x256xbf16>,
    return
  }
  func.func @transform_0(%arg0: i32) -> (i32, i32) {
    %c0_i32 = arith.constant 0 : i32
    %c0_i32_0 = arith.constant 0 : i32
    %c0_i32_1 = arith.constant 0 : i32
    return %c0_i32, %c0_i32_0 : i32, i32
  }
  func.func @transform_1(%arg0: i32) -> (i32, i32) {
    %c0_i32 = arith.constant 0 : i32
    %c0_i32_0 = arith.constant 0 : i32
    %c0_i32_1 = arith.constant 0 : i32
    return %c0_i32, %c0_i32_0 : i32, i32
  }
  func.func @transform_2(%arg0: i32) -> (i32, i32) {
    %c0_i32 = arith.constant 0 : i32
    %c0_i32_0 = arith.constant 0 : i32
    %c0_i32_1 = arith.constant 0 : i32
    return %c0_i32, %c0_i32_0 : i32, i32
  }
  func.func @transform_3(%arg0: i32) -> (i32, i32) {
    %c0_i32 = arith.constant 0 : i32
    %c0_i32_0 = arith.constant 0 : i32
    %c0_i32_1 = arith.constant 0 : i32
    return %c0_i32, %c0_i32_0 : i32, i32
  }
  func.func @transform_4(%arg0: i32) -> (i32, i32) {
    %c0_i32 = arith.constant 0 : i32
    %c0_i32_0 = arith.constant 0 : i32
    %c0_i32_1 = arith.constant 0 : i32
    return %c0_i32, %c0_i32_0 : i32, i32
  }
  func.func @transform_5(%arg0: i32) -> (i32, i32) {
    %c0_i32 = arith.constant 0 : i32
    %c0_i32_0 = arith.constant 0 : i32
    %c0_i32_1 = arith.constant 0 : i32
    return %c0_i32, %c0_i32_0 : i32, i32
  }
}

</mosaic_0001>

<bundles_post_ra>
// kernel: tpu_custom_call.1
= control target key start
LH: loop header
LB: loop body
LE: loop exit
PB: predicated region body
PF: predicated region fallthrough
CT: control target
= control target key end

     0   :  { %10 = vsyncpa [#allocation3], 0  ;;  %s524_s0 = inlined_call_operand.hbm [shape: f32[8,128], index: 0, kind: input, shape index: {}]   ;;  %s525_s1 = inlined_call_operand.hbm [shape: f32[128,256], index: 1, kind: input, shape index: {}]   ;;  %s526_s2 = inlined_call_operand.hbm [shape: f32[1,256], index: 2, kind: input, shape index: {}]   ;;  %s527_s3 = inlined_call_operand.hbm [shape: f32[256,256], index: 3, kind: input, shape index: {}]   ;;  %s528_s4 = inlined_call_operand.vmem [shape: f32[1,256], index: 4, kind: input, shape index: {}]   ;;  %s529_s5 = inlined_call_operand.hbm [shape: bf16[8,256], index: 5, kind: output, shape index: {}]  }
   0x1   :  { %11 = vsyncpa [#allocation6], 0 }
   0x2   :  { %12 = vsyncpa [#allocation9], 0  ;;  %s29_s20 = sshll.u32 %s525_s1, 4  ;;  %s30_s20 = int_to_ptr.hbm [resolvable:$true] %s29_s20 }
   0x3   :  { %13 = vsyncpa [#allocation4], 0  ;;  %s469_s21 = smov [#allocation5]   ;;  %s19_s25 = sshll.u32 %s524_s0, 4  ;;  %s20_s25 = int_to_ptr.hbm [resolvable:$true] %s19_s25 }
   0x4   :  { %s31_s22 = sshll.u32 %s469_s21, 4  ;;  %s470_s26 = smov 256   ;;  %s32_s22 = int_to_ptr.vmem [resolvable:$true] %s31_s22 }
   0x5   :  { %s471_s27 = smov 16   ;;  %s472_s28 = smov [#allocation2]  }
   0x6   :  { %37 = dma.hbm_to_vmem [thread:$0]  %s30_s20, 4096, %s32_s22, [#allocation6], %s470_s26, %s470_s26, %s471_s27  }
   0x7   :  { %s21_s29 = sshll.u32 %s472_s28, 4  ;;  %s43_s7 = sshll.u32 %s526_s2, 4  ;;  %s22_s29 = int_to_ptr.vmem [resolvable:$true] %s21_s29  ;;  %s44_s7 = int_to_ptr.hbm [resolvable:$true] %s43_s7 }
   0x8   :  { %24 = dma.hbm_to_vmem [thread:$0]  %s20_s25, 128, %s22_s29, [#allocation3]  }
   0x9   :  { %s53_s9 = sshll.u32 %s527_s3, 4  ;;  %s473_s10 = smov [#allocation7]   ;;  %s54_s9 = int_to_ptr.hbm [resolvable:$true] %s53_s9 }
   0xa   :  { %s45_s11 = sshll.u32 %s473_s10, 4  ;;  %s474_s0 = smov [#allocation8]   ;;  %s46_s11 = int_to_ptr.vmem [resolvable:$true] %s45_s11 }
   0xb   :  { %48 = dma.hbm_to_vmem [thread:$0]  %s44_s7, 32, %s46_s11, [#allocation6]  }
   0xc   :  { %s55_s12 = sshll.u32 %s474_s0, 4  ;;  %s56_s12 = int_to_ptr.vmem [resolvable:$true] %s55_s12 }
   0xd   :  { %61 = dma.hbm_to_vmem [thread:$0]  %s54_s9, 8192, %s56_s12, [#allocation9], %s470_s26, %s470_s26, %s471_s27  }
   0xe   :  { %461 = dma.done.wait [#allocation3], 128  }
   0xf   :  { %462 = vsyncadd [#allocation3], 4294967168 }
  0x10   :  { %463 = dma.done.wait [#allocation6], 4128  }
  0x11   :  { %464 = vsyncadd [#allocation6], 4294963168 }
  0x12   :  { %465 = dma.done.wait [#allocation9], 8192  }
  0x13   :  { %466 = vsyncadd [#allocation9], 4294959104  ;;  %v111_v0 = vld [vmem:[#allocation5 + $0xf0] sm:$0xff]  ;;  %v109_v1 = vld [vmem:[#allocation5 + $0xe0] sm:$0xff]  ;;  %s475_s13 = smov [#allocation10]   ;;  %s322_s17 = sshll.u32 %s529_s5, 4  ;;  %s323_s17 = int_to_ptr.hbm [resolvable:$true] %s322_s17 }
  0x14   :  { %v112_v2 = vld [vmem:[#allocation5 + $0xf8] sm:$0xff]  ;;  %119 = vmatpush.msra.mxu0 %v111_v0  ;;  %v110_v3 = vld [vmem:[#allocation5 + $0xe8] sm:$0xff]  ;;  %v107_v4 = vld [vmem:[#allocation5 + $0xd0] sm:$0xff]  ;;  %s320_s14 = sshll.u32 %s475_s13, 4  ;;  %s321_s14 = int_to_ptr.vmem [resolvable:$true] %s320_s14 }
  0x15   :  { %139 = vmatpush.msra.mxu1 %v112_v2  ;;  %v108_v5 = vld [vmem:[#allocation5 + $0xd8] sm:$0xff]  ;;  %v105_v6 = vld [vmem:[#allocation5 + $0xc0] sm:$0xff]  ;;  %v106_v7 = vld [vmem:[#allocation5 + $0xc8] sm:$0xff] }
  0x16   :  { %120 = vmatpush.msra.mxu0 %v109_v1  ;;  %v103_v8 = vld [vmem:[#allocation5 + $0xb0] sm:$0xff]  ;;  %v104_v9 = vld [vmem:[#allocation5 + $0xb8] sm:$0xff]  ;;  %v101_v10 = vld [vmem:[#allocation5 + $0xa0] sm:$0xff] }
  0x17   :  { %140 = vmatpush.msra.mxu1 %v110_v3  ;;  %v102_v11 = vld [vmem:[#allocation5 + $0xa8] sm:$0xff]  ;;  %v99_v12 = vld [vmem:[#allocation5 + $0x90] sm:$0xff]  ;;  %v100_v13 = vld [vmem:[#allocation5 + $0x98] sm:$0xff] }
  0x18   :  { %121 = vmatpush.msra.mxu0 %v107_v4  ;;  %v191_v14 = vld [vmem:[#allocation8 + $0xf0] sm:$0xff]  ;;  %v189_v15 = vld [vmem:[#allocation8 + $0xe0] sm:$0xff]  ;;  %v192_v52 = vld [vmem:[#allocation8 + $0xf8] sm:$0xff] }
  0x19   :  { %141 = vmatpush.msra.mxu1 %v108_v5  ;;  %v97_v16 = vld [vmem:[#allocation5 + $0x80] sm:$0xff]  ;;  %v98_v17 = vld [vmem:[#allocation5 + $0x88] sm:$0xff]  ;;  %231 = vmatpush.msra.mxu2 %v191_v14  ;;  %v223_v18 = vld [vmem:[#allocation8 + $0x1f0] sm:$0xff] }
  0x1a   :  { %122 = vmatpush.msra.mxu0 %v105_v6  ;;  %v187_v19 = vld [vmem:[#allocation8 + $0xd0] sm:$0xff]  ;;  %v221_v20 = vld [vmem:[#allocation8 + $0x1e0] sm:$0xff]  ;;  %251 = vmatpush.msra.mxu3 %v223_v18  ;;  %v224_v53 = vld [vmem:[#allocation8 + $0x1f8] sm:$0xff] }
  0x1b   :  { %142 = vmatpush.msra.mxu1 %v106_v7  ;;  %v95_v21 = vld [vmem:[#allocation5 + $0x70] sm:$0xff]  ;;  %v96_v22 = vld [vmem:[#allocation5 + $0x78] sm:$0xff]  ;;  %232 = vmatpush.msra.mxu2 %v189_v15  ;;  %v185_v23 = vld [vmem:[#allocation8 + $0xc0] sm:$0xff] }
  0x1c   :  { %123 = vmatpush.msra.mxu0 %v103_v8  ;;  %v219_v24 = vld [vmem:[#allocation8 + $0x1d0] sm:$0xff]  ;;  %v93_v25 = vld [vmem:[#allocation5 + $0x60] sm:$0xff]  ;;  %v94_v26 = vld [vmem:[#allocation5 + $0x68] sm:$0xff]  ;;  %252 = vmatpush.msra.mxu3 %v221_v20 }
  0x1d   :  { %143 = vmatpush.msra.mxu1 %v104_v9  ;;  %233 = vmatpush.msra.mxu2 %v187_v19  ;;  %v183_v27 = vld [vmem:[#allocation8 + $0xb0] sm:$0xff]  ;;  %v217_v28 = vld [vmem:[#allocation8 + $0x1c0] sm:$0xff]  ;;  %v190_v56 = vld [vmem:[#allocation8 + $0xe8] sm:$0xff] }
  0x1e   :  { %124 = vmatpush.msra.mxu0 %v101_v10  ;;  %v91_v29 = vld [vmem:[#allocation5 + $0x50] sm:$0xff]  ;;  %v92_v30 = vld [vmem:[#allocation5 + $0x58] sm:$0xff]  ;;  %253 = vmatpush.msra.mxu3 %v219_v24  ;;  %v181_v31 = vld [vmem:[#allocation8 + $0xa0] sm:$0xff] }
  0x1f   :  { %144 = vmatpush.msra.mxu1 %v102_v11  ;;  %234 = vmatpush.msra.mxu2 %v185_v23  ;;  %v215_v32 = vld [vmem:[#allocation8 + $0x1b0] sm:$0xff]  ;;  %v89_v33 = vld [vmem:[#allocation5 + $0x40] sm:$0xff]  ;;  %v90_v34 = vld [vmem:[#allocation5 + $0x48] sm:$0xff] }
  0x20   :  { %125 = vmatpush.msra.mxu0 %v99_v12  ;;  %254 = vmatpush.msra.mxu3 %v217_v28  ;;  %v179_v35 = vld [vmem:[#allocation8 + $0x90] sm:$0xff]  ;;  %v213_v36 = vld [vmem:[#allocation8 + $0x1a0] sm:$0xff]  ;;  %v222_v57 = vld [vmem:[#allocation8 + $0x1e8] sm:$0xff] }
  0x21   :  { %145 = vmatpush.msra.mxu1 %v100_v13  ;;  %235 = vmatpush.msra.mxu2 %v183_v27  ;;  %v87_v37 = vld [vmem:[#allocation5 + $0x30] sm:$0xff]  ;;  %v88_v38 = vld [vmem:[#allocation5 + $0x38] sm:$0xff]  ;;  %v177_v39 = vld [vmem:[#allocation8 + $0x80] sm:$0xff] }
  0x22   :  { %126 = vmatpush.msra.mxu0 %v97_v16  ;;  %255 = vmatpush.msra.mxu3 %v215_v32  ;;  %v211_v40 = vld [vmem:[#allocation8 + $0x190] sm:$0xff]  ;;  %v85_v41 = vld [vmem:[#allocation5 + $0x20] sm:$0xff]  ;;  %v86_v42 = vld [vmem:[#allocation5 + $0x28] sm:$0xff] }
  0x23   :  { %146 = vmatpush.msra.mxu1 %v98_v17  ;;  %236 = vmatpush.msra.mxu2 %v181_v31  ;;  %v175_v43 = vld [vmem:[#allocation8 + $0x70] sm:$0xff]  ;;  %v209_v44 = vld [vmem:[#allocation8 + $0x180] sm:$0xff]  ;;  %v188_v60 = vld [vmem:[#allocation8 + $0xd8] sm:$0xff] }
  0x24   :  { %127 = vmatpush.msra.mxu0 %v95_v21  ;;  %256 = vmatpush.msra.mxu3 %v213_v36  ;;  %v83_v45 = vld [vmem:[#allocation5 + $0x10] sm:$0xff]  ;;  %v84_v46 = vld [vmem:[#allocation5 + $0x18] sm:$0xff]  ;;  %v173_v47 = vld [vmem:[#allocation8 + $0x60] sm:$0xff] }
  0x25   :  { %147 = vmatpush.msra.mxu1 %v96_v22  ;;  %237 = vmatpush.msra.mxu2 %v179_v35  ;;  %v207_v48 = vld [vmem:[#allocation8 + $0x170] sm:$0xff]  ;;  %v81_v49 = vld [vmem:[#allocation5] sm:$0xff]  ;;  %v82_v50 = vld [vmem:[#allocation5 + $0x8] sm:$0xff] }
  0x26   :  { %128 = vmatpush.msra.mxu0 %v93_v25  ;;  %257 = vmatpush.msra.mxu3 %v211_v40  ;;  %v80_v51 = vld [vmem:[#allocation2] sm:$0xff]  ;;  %v205_v55 = vld [vmem:[#allocation8 + $0x160] sm:$0xff]  ;;  %v186_v0 = vld [vmem:[#allocation8 + $0xc8] sm:$0xff] }
  0x27   :  { %148 = vmatpush.msra.mxu1 %v94_v26  ;;  %238 = vmatpush.msra.mxu2 %v177_v39  ;;  %v171_v54 = vld [vmem:[#allocation8 + $0x50] sm:$0xff]  ;;  %v169_v58 = vld [vmem:[#allocation8 + $0x40] sm:$0xff]  ;;  %v220_v61 = vld [vmem:[#allocation8 + $0x1d8] sm:$0xff] }
  0x28   :  { %129 = vmatpush.msra.mxu0 %v91_v29  ;;  %258 = vmatpush.msra.mxu3 %v209_v44  ;;  %v203_v59 = vld [vmem:[#allocation8 + $0x150] sm:$0xff]  ;;  %v201_v63 = vld [vmem:[#allocation8 + $0x140] sm:$0xff]  ;;  %v218_v1 = vld [vmem:[#allocation8 + $0x1c8] sm:$0xff] }
  0x29   :  { %149 = vmatpush.msra.mxu1 %v92_v30  ;;  %239 = vmatpush.msra.mxu2 %v175_v43  ;;  %v167_v62 = vld [vmem:[#allocation8 + $0x30] sm:$0xff]  ;;  %v184_v2 = vld [vmem:[#allocation8 + $0xb8] sm:$0xff]  ;;  %v182_v4 = vld [vmem:[#allocation8 + $0xa8] sm:$0xff] }
  0x2a   :  { %130 = vmatpush.msra.mxu0 %v89_v33  ;;  %259 = vmatpush.msra.mxu3 %v207_v48  ;;  %v216_v3 = vld [vmem:[#allocation8 + $0x1b8] sm:$0xff]  ;;  %v214_v5 = vld [vmem:[#allocation8 + $0x1a8] sm:$0xff]  ;;  %v165_v19 = vld [vmem:[#allocation8 + $0x20] sm:$0xff] }
  0x2b   :  { %150 = vmatpush.msra.mxu1 %v90_v34  ;;  %240 = vmatpush.msra.mxu2 %v173_v47  ;;  %v180_v6 = vld [vmem:[#allocation8 + $0x98] sm:$0xff]  ;;  %v178_v8 = vld [vmem:[#allocation8 + $0x88] sm:$0xff]  ;;  %v199_v20 = vld [vmem:[#allocation8 + $0x130] sm:$0xff] }
  0x2c   :  { %131 = vmatpush.msra.mxu0 %v87_v37  ;;  %260 = vmatpush.msra.mxu3 %v205_v55  ;;  %v212_v7 = vld [vmem:[#allocation8 + $0x198] sm:$0xff]  ;;  %v210_v9 = vld [vmem:[#allocation8 + $0x188] sm:$0xff]  ;;  %v163_v23 = vld [vmem:[#allocation8 + $0x10] sm:$0xff] }
  0x2d   :  { %151 = vmatpush.msra.mxu1 %v88_v38  ;;  %241 = vmatpush.msra.mxu2 %v171_v54  ;;  %v176_v10 = vld [vmem:[#allocation8 + $0x78] sm:$0xff]  ;;  %v174_v12 = vld [vmem:[#allocation8 + $0x68] sm:$0xff]  ;;  %v197_v24 = vld [vmem:[#allocation8 + $0x120] sm:$0xff] }
  0x2e   :  { %132 = vmatpush.msra.mxu0 %v85_v41  ;;  %261 = vmatpush.msra.mxu3 %v203_v59  ;;  %v208_v11 = vld [vmem:[#allocation8 + $0x178] sm:$0xff]  ;;  %v206_v13 = vld [vmem:[#allocation8 + $0x168] sm:$0xff]  ;;  %v161_v27 = vld [vmem:[#allocation8] sm:$0xff] }
  0x2f   :  { %152 = vmatpush.msra.mxu1 %v86_v42  ;;  %242 = vmatpush.msra.mxu2 %v169_v58  ;;  %v172_v14 = vld [vmem:[#allocation8 + $0x58] sm:$0xff]  ;;  %v170_v16 = vld [vmem:[#allocation8 + $0x48] sm:$0xff]  ;;  %v195_v28 = vld [vmem:[#allocation8 + $0x110] sm:$0xff] }
  0x30   :  { %133 = vmatpush.msra.mxu0 %v83_v45  ;;  %262 = vmatpush.msra.mxu3 %v201_v63  ;;  %v204_v15 = vld [vmem:[#allocation8 + $0x158] sm:$0xff]  ;;  %v202_v17 = vld [vmem:[#allocation8 + $0x148] sm:$0xff]  ;;  %v193_v31 = vld [vmem:[#allocation8 + $0x100] sm:$0xff] }
  0x31   :  { %153 = vmatpush.msra.mxu1 %v84_v46  ;;  %243 = vmatpush.msra.mxu2 %v167_v62  ;;  %v168_v18 = vld [vmem:[#allocation8 + $0x38] sm:$0xff]  ;;  %v166_v21 = vld [vmem:[#allocation8 + $0x28] sm:$0xff]  ;;  %v225_v42 = vld [vmem:[%s528_s4] sm:$0x3] }
  0x32   :  { %134 = vmatpush.msra.mxu0 %v81_v49  ;;  %263 = vmatpush.msra.mxu3 %v199_v20  ;;  %v200_v22 = vld [vmem:[#allocation8 + $0x138] sm:$0xff]  ;;  %v198_v26 = vld [vmem:[#allocation8 + $0x128] sm:$0xff]  ;;  %v228_v43 = vperm.slane %v225_v42, 1  ;;  %v227_v46 = vperm.slane %v225_v42, 0 }
  0x33   :  { %154 = vmatpush.msra.mxu1 %v82_v50  ;;  %135 = vmatmul.f32.vlgmr.msra.gmra.mxu0 %v80_v51  ;;  %v164_v25 = vld [vmem:[#allocation8 + $0x18] sm:$0xff]  ;;  %v162_v29 = vld [vmem:[#allocation8 + $0x8] sm:$0xff] }
  0x34   :  { %155 = vmatmul.f32.vlgmr.msra.gmra.mxu1 %v80_v51  ;;  %271 = vmatpush.msrb.mxu0 %v192_v52  ;;  %v196_v30 = vld [vmem:[#allocation8 + $0x118] sm:$0xff]  ;;  %v194_v32 = vld [vmem:[#allocation8 + $0x108] sm:$0xff] }
  0x35   :  { %291 = vmatpush.msrb.mxu1 %v224_v53  ;;  %244 = vmatpush.msra.mxu2 %v165_v19  ;;  %v113_v33 = vld [vmem:[#allocation7] sm:$0x3] }
  0x36   :  { %272 = vmatpush.msrb.mxu0 %v190_v56  ;;  %264 = vmatpush.msra.mxu3 %v197_v24  ;;  %v115_v34 = vperm.slane %v113_v33, 0  ;;  %v116_v35 = vperm.slane %v113_v33, 1 }
  0x37   :  { %292 = vmatpush.msrb.mxu1 %v222_v57  ;;  %245 = vmatpush.msra.mxu2 %v163_v23 }
  0x38   :  { %273 = vmatpush.msrb.mxu0 %v188_v60  ;;  %265 = vmatpush.msra.mxu3 %v195_v28 }
  0x39   :  { %293 = vmatpush.msrb.mxu1 %v220_v61  ;;  %246 = vmatpush.msra.mxu2 %v161_v27 }
  0x3a   :  { %274 = vmatpush.msrb.mxu0 %v186_v0  ;;  %266 = vmatpush.msra.mxu3 %v193_v31 }
  0x3b   :  { %294 = vmatpush.msrb.mxu1 %v218_v1 }
  0x3c   :  { %275 = vmatpush.msrb.mxu0 %v184_v2 }
  0x3d   :  { %295 = vmatpush.msrb.mxu1 %v216_v3 }
  0x3e   :  { %276 = vmatpush.msrb.mxu0 %v182_v4 }
  0x3f   :  { %296 = vmatpush.msrb.mxu1 %v214_v5 }
  0x40   :  { %277 = vmatpush.msrb.mxu0 %v180_v6 }
  0x41   :  { %297 = vmatpush.msrb.mxu1 %v212_v7 }
  0x42   :  { %278 = vmatpush.msrb.mxu0 %v178_v8 }
  0x43   :  { %298 = vmatpush.msrb.mxu1 %v210_v9 }
  0x44   :  { %279 = vmatpush.msrb.mxu0 %v176_v10 }
  0x45   :  { %299 = vmatpush.msrb.mxu1 %v208_v11 }
  0x46   :  { %280 = vmatpush.msrb.mxu0 %v174_v12 }
  0x47   :  { %300 = vmatpush.msrb.mxu1 %v206_v13 }
  0x48   :  { %281 = vmatpush.msrb.mxu0 %v172_v14 }
  0x49   :  { %301 = vmatpush.msrb.mxu1 %v204_v15 }
  0x4a   :  { %282 = vmatpush.msrb.mxu0 %v170_v16 }
  0x4b   :  { %302 = vmatpush.msrb.mxu1 %v202_v17 }
  0x4c   :  { %283 = vmatpush.msrb.mxu0 %v168_v18 }
  0x4d   :  { %303 = vmatpush.msrb.mxu1 %v200_v22 }
  0x4e   :  { %284 = vmatpush.msrb.mxu0 %v166_v21 }
  0x4f   :  { %304 = vmatpush.msrb.mxu1 %v198_v26 }
  0x50   :  { %285 = vmatpush.msrb.mxu0 %v164_v25 }
  0x51   :  { %305 = vmatpush.msrb.mxu1 %v196_v30 }
  0x52   :  { %286 = vmatpush.msrb.mxu0 %v162_v29 }
  0x53   :  { %306 = vmatpush.msrb.mxu1 %v194_v32 }
  0xb0   :  { %v136_v36 = vpop.f32.mrf.mxu0 }
  0xb1   :  { %v156_v37 = vpop.f32.mrf.mxu1  ;;  %v137_v38 = vadd.f32 %v136_v36, %v115_v34 }
  0xb2   :  { %v157_v39 = vadd.f32 %v156_v37, %v116_v35 }
  0xb3   :  { %v159_v40 = vmax.f32 %v137_v38, 0.0 }
  0xb4   :  { %v160_v41 = vmax.f32 %v157_v39, 0.0 }
  0xb5   :  { %247 = vmatmul.f32.vlgmr.msra.gmra.mxu2 %v159_v40  ;;  %287 = vmatmul.f32.vlgmr.msrb.gmra.mxu0 %v159_v40 }
  0xb6   :  { %267 = vmatmul.f32.vlgmr.msra.gmra.mxu3 %v160_v41  ;;  %307 = vmatmul.f32.vlgmr.msrb.gmra.mxu1 %v160_v41 }
 0x132   :  { %v288_v44 = vpop.f32.mrf.mxu0 }
 0x133   :  { %v289_v45 = vadd.f32 %v288_v44, %v228_v43  ;;  %v308_v47 = vpop.f32.mrf.mxu1 }
 0x135   :  { %v309_v49 = vadd.f32 %v308_v47, %v289_v45 }
 0x137   :  { %v312_v53 = vmax.f32 %v309_v49, 0.0 }
 0x138   :  { %v248_v48 = vpop.f32.mrf.mxu2 }
 0x139   :  { %v249_v50 = vadd.f32 %v248_v48, %v227_v46  ;;  %v268_v51 = vpop.f32.mrf.mxu3 }
 0x13b   :  { %v269_v52 = vadd.f32 %v268_v51, %v249_v50 }
 0x13d   :  { %v311_v54 = vmax.f32 %v269_v52, 0.0 }
 0x13f   :  { %v313_v55 = vpack.c.bf16 %v312_v53, %v311_v54 }
 0x141   :  { %314 = vst [vmem:[#allocation10] sm:$0xff] %v313_v55 }
 0x142   :  { %325 = dma.vmem_to_hbm [thread:$0]  %s321_s14, 128, %s323_s17, [#allocation4]  }
 0x143   :  { %467 = dma.done.wait [#allocation4], 128  }
 0x144   :  { %468 = vsyncadd [#allocation4], 4294967168 }
 0x145   :  { %330 = vsyncpa [#allocation3], 1 }
 0x146   :  { %331 = vsyncpa [#allocation6], 1 }
 0x147   :  { %332 = vsyncpa [#allocation9], 1 }
 0x148   :  { %333 = vsyncpa [#allocation4], 1 }

</bundles_post_ra>
